<compile_context>
chip_gen: v7x
topology: tpu7x:2x2x1
jax: 0.10.0
libtpu: 0.0.40
codegen_flags: <defaults>
</compile_context>

<pallas_src>
import functools
import math

import jax
import jax.numpy as jnp
from jax.experimental import pallas as pl
from jax.experimental.pallas import tpu as pltpu


def get_connect_regular_matrix(n: int) -> jnp.ndarray:
    """JAX port of the torch helper: eye(n) with -1 superdiagonal, [0,0]=0."""
    assert n >= 2
    m = jnp.eye(n, dtype=jnp.float32)
    m = m + jnp.diag(-jnp.ones((n - 1,), dtype=jnp.float32), k=1)
    m = m.at[0, 0].set(0.0)
    return m


def _connect_loss_kernel(x_ref, mask_ref, o_ref, acc_ref, cmask_ref, *,
                         seg_len, n_rows, need_row_mask):
    """One (tb, C) lane-packed tile -> accumulate into a resident VMEM block."""
    step = pl.program_id(0)
    nb = pl.num_programs(0)
    tb, C = x_ref.shape

    @pl.when(step == 0)
    def _init():
        acc_ref[...] = jnp.zeros_like(acc_ref)
        # Lane mask: zero every packed column with (col % L) == 0.  These are
        # (a) the original column 0 of each row (M[0, 0] = 0 -> product col 0 is 0)
        # and (b) exactly the lanes where the lane shift wraps across original rows.
        lane = jax.lax.broadcasted_iota(jnp.int32, (1, C), 1)
        cmask_ref[...] = jnp.where(lane % seg_len == 0, 0.0, 1.0).astype(jnp.float32)

    # Widen right after load (inputs stay narrow in HBM; mandatory on v5e).
    x = x_ref[...].astype(jnp.float32)
    m = mask_ref[...].astype(jnp.float32)

    # First difference along lanes replaces the bidiagonal (L, L) matmul:
    #   shifted[:, j] = x[:, j-1]  (lane 0 filler is irrelevant: col 0 is masked).
    # Equivalent to jnp.roll(x, 1, axis=1) / pltpu.roll(x, 1, 1) on the used lanes.
    shifted = jnp.concatenate([x[:, :1], x[:, :-1]], axis=1)

    val = jnp.maximum(jnp.abs(x - shifted) - 1.0, 0.0) * m
    contrib = val * cmask_ref[...]                      # broadcast (1, C) -> (tb, C)

    if need_row_mask:
        # Last grid block overhangs the packed array; discard invalid rows with a
        # select (NOT a multiply) so uninitialized/NaN padding cannot poison the sum.
        row = jax.lax.broadcasted_iota(jnp.int32, (tb, C), 0) + step * tb
        contrib = jnp.where(row < n_rows, contrib, 0.0)

    acc_ref[...] += contrib                             # pure VPU add per step

    @pl.when(step == nb - 1)
    def _finalize():
        o_ref[0, 0] = jnp.sum(acc_ref[...])             # single reduction at the end


def connect_loss(x: jnp.ndarray, mask: jnp.ndarray, *,
                 tile_elems: int = 512 * 1024,          # ~2 MiB f32 per input block
                 max_pack_lanes: int = 4096) -> jnp.ndarray:
    """Pallas implementation of ConnectLoss.forward(x, mask) -> scalar loss."""
    assert x.ndim == 2 and x.shape == mask.shape
    B, L = x.shape
    assert L >= 2

    # ---- lane packing: last dim C is a multiple of 128 (and of L) -------------
    if L % 128 == 0:
        g, C = 1, L
    else:
        g = 128 // math.gcd(L, 128)
        C = L * g
        if C > max_pack_lanes:          # pathological L: fall back to unpacked
            g, C = 1, L

    if g > 1 and B % g != 0:
        # Tiny pad (< g <= 128 zero rows) so the packing reshape stays free.
        # Zero rows contribute exactly 0 (|0 - 0| - 1 < 0 and mask = 0).
        pad_rows = g - (B % g)
        x = jnp.concatenate([x, jnp.zeros((pad_rows, L), x.dtype)], axis=0)
        mask = jnp.concatenate([mask, jnp.zeros((pad_rows, L), mask.dtype)], axis=0)
        B = B + pad_rows

    R = (B * L) // C                    # packed rows
    xp = x.reshape(R, C)                # free row-major reshape (no data movement)
    mp = mask.reshape(R, C)

    # ---- tile rows: big lane-dense blocks, v7x-VMEM-safe -----------------------
    tb = max(1, tile_elems // C)
    if tb >= R:
        tb = R                          # block == full dim is always legal
    else:
        tb = max(8, (tb // 8) * 8)      # sublane multiple of 8
        if tb >= R:
            tb = R
    nb = pl.cdiv(R, tb)
    need_row_mask = (R % tb) != 0       # in-kernel remainder masking, no jnp.pad

    kernel = functools.partial(
        _connect_loss_kernel,
        seg_len=L, n_rows=R, need_row_mask=need_row_mask,
    )

    out = pl.pallas_call(
        kernel,
        out_shape=jax.ShapeDtypeStruct((1, 1), jnp.float32),
        grid=(nb,),
        in_specs=[
            pl.BlockSpec((tb, C), lambda i: (i, 0)),    # x tile (native dtype)
            pl.BlockSpec((tb, C), lambda i: (i, 0)),    # mask tile (native dtype)
        ],
        # Scalar result, written once on the last grid step.
        out_specs=pl.BlockSpec((1, 1), lambda i: (0, 0),
                               memory_space=pltpu.MemorySpace.SMEM),
        scratch_shapes=[
            pltpu.VMEM((tb, C), jnp.float32),           # resident vector accumulator
            pltpu.VMEM((1, C), jnp.float32),            # precomputed column mask
        ],
        compiler_params=pltpu.CompilerParams(
            # Resident accumulator -> reduction axis stays "arbitrary".
            dimension_semantics=("arbitrary",),
        ),
    )(xp, mp)
    return out[0, 0]


def connect_loss_ref(x, mask, reg_matrix):
    """Pure-JAX reference matching the PyTorch forward (uses the dense M)."""
    prod = x.astype(jnp.float32) @ reg_matrix
    diff = jnp.abs(prod) - 1.0
    return jnp.sum(jax.nn.relu(diff) * mask.astype(jnp.float32))


if __name__ == "__main__":
    # Small shapes consistent with the module: x is (batch, length).
    batch, length = 64, 16

    key = jax.random.PRNGKey(0)
    kx, km, kx3, km3 = jax.random.split(key, 4)
    x = jax.random.normal(kx, (batch, length), dtype=jnp.float32) * 2.0
    mask = (jax.random.uniform(km, (batch, length)) > 0.3).astype(jnp.float32)

    reg_matrix = get_connect_regular_matrix(length)     # only used by the reference

    # 1) basic case (single lane-packed block)
    loss = jax.block_until_ready(connect_loss(x, mask))
    loss_ref = jax.block_until_ready(connect_loss_ref(x, mask, reg_matrix))
    assert jnp.allclose(loss, loss_ref, rtol=1e-5, atol=1e-3), (loss, loss_ref)

    # 2) batch not divisible by the packing factor (exercises the small row pad)
    x2, m2 = x[:37], mask[:37]
    loss2 = jax.block_until_ready(connect_loss(x2, m2))
    loss2_ref = jax.block_until_ready(connect_loss_ref(x2, m2, reg_matrix))
    assert jnp.allclose(loss2, loss2_ref, rtol=1e-5, atol=1e-3), (loss2, loss2_ref)

    # 3) multi-step grid with a non-divisible last block (exercises the in-kernel
    #    row-validity masking and the resident accumulator across steps)
    x3 = jax.random.normal(kx3, (200, length), dtype=jnp.float32) * 2.0
    m3 = (jax.random.uniform(km3, (200, length)) > 0.5).astype(jnp.float32)
    loss3 = jax.block_until_ready(connect_loss(x3, m3, tile_elems=1024))
    loss3_ref = jax.block_until_ready(connect_loss_ref(x3, m3, reg_matrix))
    assert jnp.allclose(loss3, loss3_ref, rtol=1e-5, atol=1e-3), (loss3, loss3_ref)

    print("KERNEL_OK")
</pallas_src>

<mosaic_0001>
module attributes {stable_mosaic.version = 11 : i64} {
  func.func @_connect_loss_kernel(%arg0: i32, %arg1: memref<8x128xf32, #tpu.memory_space<vmem>>, %arg2: memref<8x128xf32, #tpu.memory_space<vmem>>, %arg3: memref<1x1xf32, #tpu.memory_space<smem>>, %arg4: memref<8x128xf32, #tpu.memory_space<vmem>>, %arg5: memref<1x128xf32, #tpu.memory_space<vmem>>) attributes {dimension_semantics = [#tpu.dimension_semantics<arbitrary>], iteration_bounds = array<i64: 1>, scalar_prefetch = 0 : i64, scratch_operands = 2 : i64, tpu.core_type = #tpu.core_type<tc>, window_params = [{transform_indices = @transform_0, window_bounds = array<i64: 8, 128>}, {transform_indices = @transform_1, window_bounds = array<i64: 8, 128>}, {transform_indices = @transform_2, window_bounds = array<i64: 1, 1>}]} {
    %c0_i32 = arith.constant 0 : i32
    %0 = arith.cmpi eq, %arg0, %c0_i32 : i32
    %1 = arith.extui %0 : i1 to i32
    %c0_i32_0 = arith.constant 0 : i32
    %2 = arith.cmpi ne, %1, %c0_i32_0 : i32
    scf.if %2 {
      %cst_13 = arith.constant 0.000000e+00 : f32
      %24 = vector.broadcast %cst_13 : f32 to vector<8x128xf32>
      %c0_14 = arith.constant 0 : index
      %c0_15 = arith.constant 0 : index
      %25 = vector.load %arg4[%c0_14, %c0_15] : memref<8x128xf32, #tpu.memory_space<vmem>>, vector<8x128xf32>
      tpu.vector_store %arg4[%c0_14, %c0_15], %24 {strides = array<i32>} : memref<8x128xf32, #tpu.memory_space<vmem>>, vector<8x128xf32>,
      %26 = tpu.iota {dimensions = array<i32: 1>} : vector<1x128xi32>
      %c16_i32 = arith.constant 16 : i32
      %c0_i32_16 = arith.constant 0 : i32
      %27 = arith.cmpi eq, %c16_i32, %c0_i32_16 : i32
      %c1_i32 = arith.constant 1 : i32
      %28 = arith.select %27, %c1_i32, %c16_i32 : i32
      %29 = vector.broadcast %28 : i32 to vector<1x128xi32>
      %30 = arith.remsi %26, %29 : vector<1x128xi32>
      %c0_i32_17 = arith.constant 0 : i32
      %31 = vector.broadcast %c0_i32_17 : i32 to vector<1x128xi32>
      %32 = arith.cmpi ne, %30, %31 : vector<1x128xi32>
      %c0_i32_18 = arith.constant 0 : i32
      %33 = vector.broadcast %c0_i32_18 : i32 to vector<1x128xi32>
      %34 = arith.cmpi slt, %30, %33 : vector<1x128xi32>
      %c0_i32_19 = arith.constant 0 : i32
      %35 = arith.cmpi slt, %28, %c0_i32_19 : i32
      %36 = vector.broadcast %35 : i1 to vector<1x128xi1>
      %37 = vector.broadcast %36 : vector<1x128xi1> to vector<1x128xi1>
      %38 = arith.xori %34, %37 : vector<1x128xi1>
      %39 = arith.andi %38, %32 : vector<1x128xi1>
      %40 = vector.broadcast %28 : i32 to vector<1x128xi32>
      %41 = arith.addi %30, %40 : vector<1x128xi32>
      %42 = arith.select %39, %41, %30 : vector<1x128xi1>, vector<1x128xi32>
      %c0_i32_20 = arith.constant 0 : i32
      %43 = vector.broadcast %c0_i32_20 : i32 to vector<1x128xi32>
      %44 = arith.cmpi eq, %42, %43 : vector<1x128xi32>
      %cst_21 = arith.constant 0.000000e+00 : f32
      %cst_22 = arith.constant 1.000000e+00 : f32
      %45 = vector.broadcast %cst_21 : f32 to vector<1x128xf32>
      %46 = vector.broadcast %cst_22 : f32 to vector<1x128xf32>
      %47 = arith.select %44, %45, %46 : vector<1x128xi1>, vector<1x128xf32>
      %c0_23 = arith.constant 0 : index
      %c0_24 = arith.constant 0 : index
      %48 = vector.load %arg5[%c0_23, %c0_24] : memref<1x128xf32, #tpu.memory_space<vmem>>, vector<1x128xf32>
      tpu.vector_store %arg5[%c0_23, %c0_24], %47 {strides = array<i32>} : memref<1x128xf32, #tpu.memory_space<vmem>>, vector<1x128xf32>,
    } else {
    }
    %c0 = arith.constant 0 : index
    %c0_1 = arith.constant 0 : index
    %3 = vector.load %arg1[%c0, %c0_1] : memref<8x128xf32, #tpu.memory_space<vmem>>, vector<8x128xf32>
    %c0_2 = arith.constant 0 : index
    %c0_3 = arith.constant 0 : index
    %4 = vector.load %arg2[%c0_2, %c0_3] : memref<8x128xf32, #tpu.memory_space<vmem>>, vector<8x128xf32>
    %5 = vector.extract_strided_slice %3 {offsets = [0, 0], sizes = [8, 1], strides = [1, 1]} : vector<8x128xf32> to vector<8x1xf32>
    %6 = vector.extract_strided_slice %3 {offsets = [0, 0], sizes = [8, 127], strides = [1, 1]} : vector<8x128xf32> to vector<8x127xf32>
    %7 = tpu.concatenate %5, %6 in 1 : vector<8x1xf32>, vector<8x127xf32> -> vector<8x128xf32>
    %8 = arith.subf %3, %7 : vector<8x128xf32>
    %9 = math.absf %8 : vector<8x128xf32>
    %cst = arith.constant 1.000000e+00 : f32
    %10 = vector.broadcast %cst : f32 to vector<8x128xf32>
    %11 = arith.subf %9, %10 : vector<8x128xf32>
    %cst_4 = arith.constant 0.000000e+00 : f32
    %12 = vector.broadcast %cst_4 : f32 to vector<8x128xf32>
    %13 = arith.maximumf %11, %12 : vector<8x128xf32>
    %14 = arith.mulf %13, %4 : vector<8x128xf32>
    %c0_5 = arith.constant 0 : index
    %c0_6 = arith.constant 0 : index
    %15 = vector.load %arg5[%c0_5, %c0_6] : memref<1x128xf32, #tpu.memory_space<vmem>>, vector<1x128xf32>
    %16 = vector.broadcast %15 : vector<1x128xf32> to vector<8x128xf32>
    %17 = arith.mulf %14, %16 : vector<8x128xf32>
    %c0_7 = arith.constant 0 : index
    %c0_8 = arith.constant 0 : index
    %18 = vector.load %arg4[%c0_7, %c0_8] : memref<8x128xf32, #tpu.memory_space<vmem>>, vector<8x128xf32>
    %19 = arith.addf %18, %17 : vector<8x128xf32>
    %c0_9 = arith.constant 0 : index
    %c0_10 = arith.constant 0 : index
    %20 = vector.load %arg4[%c0_9, %c0_10] : memref<8x128xf32, #tpu.memory_space<vmem>>, vector<8x128xf32>
    tpu.vector_store %arg4[%c0_9, %c0_10], %19 {strides = array<i32>} : memref<8x128xf32, #tpu.memory_space<vmem>>, vector<8x128xf32>,
    %c0_i32_11 = arith.constant 0 : i32
    %21 = arith.cmpi eq, %arg0, %c0_i32_11 : i32
    %22 = arith.extui %21 : i1 to i32
    %c0_i32_12 = arith.constant 0 : i32
    %23 = arith.cmpi ne, %22, %c0_i32_12 : i32
    scf.if %23 {
      %c0_13 = arith.constant 0 : index
      %c0_14 = arith.constant 0 : index
      %24 = vector.load %arg4[%c0_13, %c0_14] : memref<8x128xf32, #tpu.memory_space<vmem>>, vector<8x128xf32>
      %25 = vector.shape_cast %24 : vector<8x128xf32> to vector<1x8x128xf32>
      %cst_15 = arith.constant dense<0.000000e+00> : vector<1xf32>
      %26 = vector.multi_reduction <add>, %25, %cst_15 [1, 2] : vector<1x8x128xf32> to vector<1xf32>
      %27 = vector.shape_cast %26 : vector<1xf32> to vector<1x1x1xf32>
      %28 = vector.extract %27[0, 0, 0] : f32 from vector<1x1x1xf32>
      %c0_16 = arith.constant 0 : index
      %c0_17 = arith.constant 0 : index
      %29 = memref.load %arg3[%c0_16, %c0_17] : memref<1x1xf32, #tpu.memory_space<smem>>
      memref.store %28, %arg3[%c0_16, %c0_17] : memref<1x1xf32, #tpu.memory_space<smem>>
    } else {
    }
    return
  }
  func.func @transform_0(%arg0: i32) -> (i32, i32) {
    %c0_i32 = arith.constant 0 : i32
    %c0_i32_0 = arith.constant 0 : i32
    return %arg0, %c0_i32 : i32, i32
  }
  func.func @transform_1(%arg0: i32) -> (i32, i32) {
    %c0_i32 = arith.constant 0 : i32
    %c0_i32_0 = arith.constant 0 : i32
    return %arg0, %c0_i32 : i32, i32
  }
  func.func @transform_2(%arg0: i32) -> (i32, i32) {
    %c0_i32 = arith.constant 0 : i32
    %c0_i32_0 = arith.constant 0 : i32
    %c0_i32_1 = arith.constant 0 : i32
    return %c0_i32, %c0_i32_0 : i32, i32
  }
}

</mosaic_0001>

<bundles_post_ra>
// kernel: tpu_custom_call.1
= control target key start
LH: loop header
LB: loop body
LE: loop exit
PB: predicated region body
PF: predicated region fallthrough
CT: control target
= control target key end

     0   :  { %7 = vsyncpa [#allocation5], 0  ;;  %s237_s0 = inlined_call_operand.hbm [shape: f32[8,128], index: 0, kind: input, shape index: {}]   ;;  %s238_s1 = inlined_call_operand.hbm [shape: f32[8,128], index: 1, kind: input, shape index: {}]   ;;  %s239_s2 = inlined_call_operand.hbm [shape: f32[1,1], index: 2, kind: output, shape index: {}]  }
   0x1   :  { %8 = vsyncpa [#allocation8], 0 }
   0x2   :  { %9 = vsyncpa [#allocation6], 0  ;;  %s181_s9 = smov [#allocation4]   ;;  %s182_s11 = smov [#allocation7]  }
   0x3   :  { %s16_s10 = sshll.u32 %s181_s9, 4  ;;  %s26_s12 = sshll.u32 %s182_s11, 4  ;;  %s17_s10 = int_to_ptr.vmem [resolvable:$true] %s16_s10  ;;  %s27_s12 = int_to_ptr.vmem [resolvable:$true] %s26_s12 }
   0x4   :  { %s121_s15 = scalar_lea.hbm %s237_s0, 128 }
   0x5   :  { %p122_p0 = scmp.ne.s32.totalorder %s237_s0, %s121_s15  ;;  %p125_p1 = scmp.lt.u32.totalorder %s121_s15, %s237_s0 }
   0x7   :  { %p127_p2 = pnand %p125_p1, %p122_p0 }
   0x9   :  { %130 = shalt.err (!%p127_p2)
}
   0xa   :  { %s131_s20 = scalar_lea.vmem %s17_s10, 128  ;;  %p136_p4 = scmp.lt.s32.totalorder %s17_s10, %s17_s10 }
   0xb   :  { %p132_p3 = scmp.ne.s32.totalorder %s17_s10, %s131_s20  ;;  %p137_p5 = scmp.lt.s32.totalorder %s131_s20, %s131_s20 }
   0xd   :  { %p138_p6 = por %p137_p5, %p136_p4 }
   0xf   :  { %p139_p7 = pnand %p138_p6, %p132_p3 }
  0x11   :  { %142 = shalt.err (!%p139_p7)
}
  0x12   :  { %19 = dma.hbm_to_vmem [thread:$0]  %s237_s0, 128, %s17_s10, [#allocation5]  }
  0x13   :  { %s143_s25 = scalar_lea.hbm %s238_s1, 128 }
  0x14   :  { %p144_p8 = scmp.ne.s32.totalorder %s238_s1, %s143_s25  ;;  %p147_p9 = scmp.lt.u32.totalorder %s143_s25, %s238_s1 }
  0x16   :  { %p149_p10 = pnand %p147_p9, %p144_p8 }
  0x18   :  { %152 = shalt.err (!%p149_p10)
}
  0x19   :  { %s153_s30 = scalar_lea.vmem %s27_s12, 128  ;;  %p158_p12 = scmp.lt.s32.totalorder %s27_s12, %s27_s12 }
  0x1a   :  { %p154_p11 = scmp.ne.s32.totalorder %s27_s12, %s153_s30  ;;  %p159_p13 = scmp.lt.s32.totalorder %s153_s30, %s153_s30 }
  0x1c   :  { %p160_p0 = por %p159_p13, %p158_p12 }
  0x1e   :  { %p161_p1 = pnand %p160_p0, %p154_p11 }
  0x20   :  { %164 = shalt.err (!%p161_p1)
}
  0x21   :  { %29 = dma.hbm_to_vmem [thread:$0]  %s238_s1, 128, %s27_s12, [#allocation8]  }
  0x22   :  { %175 = dma.done.wait [#allocation5], 128  }
  0x23   :  { %176 = vsyncadd [#allocation5], 4294967168 }
  0x24   :  { %177 = dma.done.wait [#allocation8], 128  }
  0x25   :  { %178 = vsyncadd [#allocation8], 4294967168  ;;  %v41_v0 = vlaneseq  ;;  %v183_v3 = vmov 1.0   ;;  %v58_v5 = vld [vmem:[#allocation4] sm:$0xff]  ;;  %s184_s4 = smov 1   ;;  %vm64_vm1 = vcmask 7168  }
  0x26   :  { %61 = vrot.lane.b32.xlu0 %v58_v5, %s184_s4  ;;  %v59_v11 = vld [vmem:[#allocation7] sm:$0xff]  ;;  %s165_s7 = scalar_lea.hbm %s239_s2, 16 }
  0x27   :  { %v42_v1 = vand.u32 127, %v41_v0  ;;  %p166_p2 = scmp.ne.s32.totalorder %s239_s2, %s165_s7  ;;  %p169_p3 = scmp.lt.u32.totalorder %s165_s7, %s239_s2 }
  0x29   :  { %v47_v2 = vand.u32 15, %v42_v1  ;;  %p171_p4 = pnand %p169_p3, %p166_p2 }
  0x2b   :  { %vm55_vm0 = vcmp.eq.s32.totalorder %v47_v2, 0 }
  0x2c   :  { %v56_v4 = vsel %vm55_vm0, 0.0, %v183_v3 }
  0x2d   :  { %57 = vst [vmem:[#allocation3] sm:$0x1] %v56_v4 }
  0x34   :  { %v113_v13 = vld [vmem:[#allocation3] ss:$0 sm:$0xff] }
  0x98   :  { %v62_v6 = vpop.permute.xlu0 %61 }
  0x99   :  { %v65_v7 = vsel %vm64_vm1, %v58_v5, %v62_v6 }
  0x9a   :  { %v66_v8 = vsub.f32 %v58_v5, %v65_v7 }
  0x9c   :  { %v67_v9 = vand.u32 2147483647, %v66_v8 }
  0x9e   :  { %v112_v10 = vadd.f32 -1.0, %v67_v9 }
  0xa0   :  { %v69_v12 = vmax.f32 %v112_v10, 0.0 }
  0xa2   :  { %v70_v14 = vmul.f32 %v69_v12, %v59_v11 }
  0xa4   :  { %v78_v15 = vmul.f32 %v113_v13, %v70_v14 }
  0xa6   :  { %86 = vadd.xlane.f32.xlu0 %v78_v15 }
 0x133   :  { %v87_v16 = vpop.xlane.xlu0 %86 }
 0x134   :  { %v88_v17 = vrot.slane %v87_v16, 4 }
 0x136   :  { %v89_v18 = vadd.f32 %v88_v17, %v87_v16 }
 0x138   :  { %v90_v19 = vrot.slane %v89_v18, 2 }
 0x13a   :  { %v91_v20 = vadd.f32 %v90_v19, %v89_v18 }
 0x13c   :  { %v92_v21 = vrot.slane %v91_v20, 1 }
 0x13e   :  { %v93_v22 = vadd.f32 %v92_v21, %v91_v20 }
 0x140   :  { %114 = vpush %v93_v22 }
 0x171   :  { %s115_s1 = spop %114 }
 0x172   :  { %96 = sst [smem:[#allocation9]] %s115_s1 }
 0x173   :  { %174 = shalt.err (!%p171_p4)
}
 0x174   :  { %s185_s12 = smov [#allocation9]  }
 0x175   :  { %104 = dma.smem_to_hbm %s185_s12, 16, %s239_s2, [#allocation6]  }
 0x176   :  { %179 = dma.done.wait [#allocation6], 16  }
 0x177   :  { %180 = vsyncadd [#allocation6], 4294967280 }
 0x178   :  { %108 = sfence }
 0x179   :  { %109 = vsyncpa [#allocation5], 1 }
 0x17a   :  { %110 = vsyncpa [#allocation8], 1 }
 0x17b   :  { %111 = vsyncpa [#allocation6], 1 }

</bundles_post_ra>
